<compile_context>
chip_gen: v5e
topology: v5e:2x2
jax: 0.10.0
libtpu: 0.0.40
codegen_flags: <defaults>
</compile_context>

<pallas_src>
import functools

import jax
import jax.numpy as jnp
from jax.experimental import pallas as pl
from jax.experimental.pallas import tpu as pltpu


# ----------------------------------------------------------------------------
# Shared excitation MLP (operates on f32 values already resident in vregs).
# ----------------------------------------------------------------------------
def _excitation(gap, w1, b1_row, w2, b2_row, use_mxu):
    """gap: (N, C) f32 -> sigmoid gate (N, C) f32.

    w1: (Ch, C), b1_row: (1, Ch), w2: (C, Ch), b2_row: (1, C), all f32."""
    if use_mxu:
        # Two small MXU matmuls, contracting on the shared axis (trans_b form,
        # no explicit transpose needed).  Hides under the x-tile DMA.
        h = jax.lax.dot_general(gap, w1, (((1,), (1,)), ((), ())),
                                preferred_element_type=jnp.float32)
        h = jnp.maximum(h + b1_row, 0.0)
        y = jax.lax.dot_general(h, w2, (((1,), (1,)), ((), ())),
                                preferred_element_type=jnp.float32)
    else:
        # VPU/XLU path: broadcast-multiply + lane reductions.  Right call for
        # tiny C; avoids degenerate per-step MXU push/pop latency.
        h = jnp.sum(w1[None, :, :] * gap[:, None, :], axis=-1)      # (N, Ch)
        h = jnp.maximum(h + b1_row, 0.0)
        y = jnp.sum(w2[None, :, :] * h[:, None, :], axis=-1)        # (N, C)
    return jax.nn.sigmoid(y + b2_row)


# ----------------------------------------------------------------------------
# Fused single-pass kernel: GAP + excitation MLP + scale, one x tile per step.
# ----------------------------------------------------------------------------
def _se_fused_kernel(x_ref, w1_ref, b1_ref, w2_ref, b2_ref, o_ref, *,
                     inv_hw, use_mxu):
    # x/o block: (Bt, C, HW); weights/biases resident in VMEM across the grid.
    # Squeeze: f32 sum over the spatial lanes, normalized by the TRUE HW.
    gap = jnp.sum(x_ref[...].astype(jnp.float32), axis=-1) * inv_hw   # (Bt, C)
    y = _excitation(gap, w1_ref[...], b1_ref[...], w2_ref[...], b2_ref[...],
                    use_mxu)                                          # (Bt, C)
    # Scale: re-read x from VMEM (cheap vld stream) instead of keeping the big
    # tile live across the MLP (would spill vregs through the single vst slot).
    o_ref[...] = (x_ref[...] * y[:, :, None]).astype(o_ref.dtype)


# ----------------------------------------------------------------------------
# Two-pass fallback kernels (used when one (C, HW) slab exceeds the budget).
# ----------------------------------------------------------------------------
def _row_sum_kernel(x_ref, s_ref):
    # x block: (Rt, HW) -> per-row f32 sums (Rt, 1).  Out-of-bounds rows of a
    # partial last block produce garbage sums whose writes Pallas discards.
    s_ref[...] = jnp.sum(x_ref[...].astype(jnp.float32), axis=-1, keepdims=True)


def _gate_kernel(sum_ref, w1_ref, b1_ref, w2_ref, b2_ref, g_ref, *,
                 inv_hw, use_mxu):
    gap = sum_ref[...] * inv_hw                                        # (B, C)
    g_ref[...] = _excitation(gap, w1_ref[...], b1_ref[...], w2_ref[...],
                             b2_ref[...], use_mxu)


def _scale_kernel(x_ref, g_ref, o_ref):
    # x block: (Rt, HW); g block: (Rt, 1) f32 -> lane-broadcast multiply.
    o_ref[...] = (x_ref[...] * g_ref[...]).astype(o_ref.dtype)


# ----------------------------------------------------------------------------
# Hardware-aware sizing helpers.
# ----------------------------------------------------------------------------
def _vmem_capacity_bytes():
    try:
        cap = int(getattr(pltpu.get_tpu_info(), "vmem_capacity_bytes", 0))
        if cap > 0:
            return min(cap, 128 << 20)
    except Exception:
        pass
    return 64 << 20   # conservative: v7x per-TC VMEM


def _choose_block_batch(B, C, HW, budget_bytes, elt_bytes):
    """Largest batch block Bt dividing B whose double-buffered in+out tiles fit
    `budget_bytes`; prefers >= 4 grid steps (2 per TC on v7x) with tiles of at
    least ~2 MiB, then >= 4 steps, then >= 2, then the biggest that fits."""
    per_batch = C * HW * elt_bytes
    max_bt = max(1, budget_bytes // (4 * per_batch))    # 2 bufs x (in + out)
    divs = [d for d in range(1, B + 1) if B % d == 0 and d <= max_bt]
    for pred in (lambda d: B // d >= 4 and d * per_batch >= (2 << 20),
                 lambda d: B // d >= 4,
                 lambda d: B // d >= 2):
        good = [d for d in divs if pred(d)]
        if good:
            return max(good)
    return max(divs)


def _choose_row_block(n_rows, HW, budget_bytes, elt_bytes):
    """Row block for the two-pass fallback: multiple of 8 (or the full B*C),
    double-buffered in+out tiles within budget, aiming for >= 4 grid steps."""
    if n_rows <= 8:
        return n_rows
    per_row_tile = 4 * HW * elt_bytes                   # in + out, 2 buffers
    fit = max(1, budget_bytes // per_row_tile)
    steps_cap = max(1, n_rows // 4)
    rt = max(8, (min(fit, steps_cap) // 8) * 8)
    return min(rt, max(8, (n_rows // 8) * 8))


# ----------------------------------------------------------------------------
# Public wrapper.
# ----------------------------------------------------------------------------
def channel_importance(x, w1, b1, w2, b2, *, tile_budget_bytes=None,
                       use_mxu=None):
    """x: (B, C, H, W) f32/bf16.  w1: (Ch, C), b1: (Ch,), w2: (C, Ch), b2: (C,)."""
    B, C, H, W = x.shape
    Ch = w1.shape[0]
    HW = H * W
    elt = x.dtype.itemsize
    if use_mxu is None:
        use_mxu = C >= 256            # MXU excitation pays off at larger C

    vmem_cap = _vmem_capacity_bytes()
    if tile_budget_bytes is None:
        tile_budget_bytes = int(0.40 * vmem_cap)
    vmem_limit = max(32 << 20, min(int(0.85 * vmem_cap), 128 << 20))

    w1 = w1.astype(jnp.float32)
    w2 = w2.astype(jnp.float32)
    b1_row = b1.reshape(1, Ch).astype(jnp.float32)
    b2_row = b2.reshape(1, C).astype(jnp.float32)

    x_flat = x.reshape(B, C, HW)      # contiguous reshape: no HBM copy
    inv_hw = 1.0 / float(HW)
    mlp_flops = 4 * B * C * Ch

    if 4 * C * HW * elt <= tile_budget_bytes:
        # ---------------- Fused single-pass path ----------------
        Bt = _choose_block_batch(B, C, HW, tile_budget_bytes, elt)
        grid = (B // Bt,)
        out_flat = pl.pallas_call(
            functools.partial(_se_fused_kernel, inv_hw=inv_hw, use_mxu=use_mxu),
            out_shape=jax.ShapeDtypeStruct((B, C, HW), x.dtype),
            grid_spec=pltpu.PrefetchScalarGridSpec(
                num_scalar_prefetch=0,
                grid=grid,
                in_specs=[
                    pl.BlockSpec((Bt, C, HW), lambda b: (b, 0, 0)),  # x tile
                    pl.BlockSpec((Ch, C), lambda b: (0, 0)),         # w1 (resident)
                    pl.BlockSpec((1, Ch), lambda b: (0, 0)),         # b1 row
                    pl.BlockSpec((C, Ch), lambda b: (0, 0)),         # w2 (resident)
                    pl.BlockSpec((1, C), lambda b: (0, 0)),          # b2 row
                ],
                out_specs=pl.BlockSpec((Bt, C, HW), lambda b: (b, 0, 0)),
            ),
            compiler_params=pltpu.CompilerParams(
                dimension_semantics=("parallel",),
                vmem_limit_bytes=vmem_limit,
            ),
            cost_estimate=pl.CostEstimate(
                flops=3 * B * C * HW + mlp_flops,
                transcendentals=B * C,
                bytes_accessed=2 * B * C * HW * elt + 4 * (2 * C * Ch + C + Ch),
            ),
        )(x_flat, w1, b1_row, w2, b2_row)
        return out_flat.reshape(B, C, H, W)

    # ---------------- Two-pass fallback (slab > VMEM budget) ----------------
    n_rows = B * C
    x2d = x_flat.reshape(n_rows, HW)                    # free reshape
    Rt = _choose_row_block(n_rows, HW, tile_budget_bytes, elt)
    row_grid = (pl.cdiv(n_rows, Rt),)

    # Pass 1: per-(b, c) spatial sums, tiled over B*C rows.
    sums = pl.pallas_call(
        _row_sum_kernel,
        out_shape=jax.ShapeDtypeStruct((n_rows, 1), jnp.float32),
        grid_spec=pltpu.PrefetchScalarGridSpec(
            num_scalar_prefetch=0,
            grid=row_grid,
            in_specs=[pl.BlockSpec((Rt, HW), lambda r: (r, 0))],
            out_specs=pl.BlockSpec((Rt, 1), lambda r: (r, 0)),
        ),
        compiler_params=pltpu.CompilerParams(
            dimension_semantics=("parallel",),
            vmem_limit_bytes=vmem_limit,
        ),
        cost_estimate=pl.CostEstimate(
            flops=n_rows * HW, transcendentals=0,
            bytes_accessed=n_rows * HW * elt + n_rows * 4),
    )(x2d)

    # Pass 2: tiny excitation MLP on the (B, C) means (single grid step).
    gate = pl.pallas_call(
        functools.partial(_gate_kernel, inv_hw=inv_hw, use_mxu=use_mxu),
        out_shape=jax.ShapeDtypeStruct((B, C), jnp.float32),
        grid_spec=pltpu.PrefetchScalarGridSpec(
            num_scalar_prefetch=0,
            grid=(1,),
            in_specs=[
                pl.BlockSpec((B, C), lambda i: (0, 0)),
                pl.BlockSpec((Ch, C), lambda i: (0, 0)),
                pl.BlockSpec((1, Ch), lambda i: (0, 0)),
                pl.BlockSpec((C, Ch), lambda i: (0, 0)),
                pl.BlockSpec((1, C), lambda i: (0, 0)),
            ],
            out_specs=pl.BlockSpec((B, C), lambda i: (0, 0)),
        ),
        compiler_params=pltpu.CompilerParams(
            dimension_semantics=("arbitrary",)),
        cost_estimate=pl.CostEstimate(
            flops=mlp_flops, transcendentals=B * C,
            bytes_accessed=4 * (2 * B * C + 2 * C * Ch + C + Ch)),
    )(sums.reshape(B, C), w1, b1_row, w2, b2_row)

    # Pass 3: row-tiled per-channel scale.
    out2d = pl.pallas_call(
        _scale_kernel,
        out_shape=jax.ShapeDtypeStruct((n_rows, HW), x.dtype),
        grid_spec=pltpu.PrefetchScalarGridSpec(
            num_scalar_prefetch=0,
            grid=row_grid,
            in_specs=[
                pl.BlockSpec((Rt, HW), lambda r: (r, 0)),
                pl.BlockSpec((Rt, 1), lambda r: (r, 0)),
            ],
            out_specs=pl.BlockSpec((Rt, HW), lambda r: (r, 0)),
        ),
        compiler_params=pltpu.CompilerParams(
            dimension_semantics=("parallel",),
            vmem_limit_bytes=vmem_limit,
        ),
        cost_estimate=pl.CostEstimate(
            flops=n_rows * HW, transcendentals=0,
            bytes_accessed=2 * n_rows * HW * elt + n_rows * 4),
    )(x2d, gate.reshape(n_rows, 1))

    return out2d.reshape(B, C, H, W)


# ----------------------------------------------------------------------------
# Pure-JAX reference matching the PyTorch forward (f32 math).
# ----------------------------------------------------------------------------
def _reference(x, w1, b1, w2, b2):
    xf = x.astype(jnp.float32)
    y = jnp.mean(xf, axis=(2, 3))                  # (B, C)
    y = jnp.maximum(y @ w1.T + b1, 0.0)            # (B, Ch)
    y = jax.nn.sigmoid(y @ w2.T + b2)              # (B, C)
    return xf * y[:, :, None, None]


if __name__ == "__main__":
    root = jax.random.PRNGKey(0)

    def make_inputs(key, B, C, Ch, H, W, dtype=jnp.float32):
        kx, k1, k2, k3, k4 = jax.random.split(key, 5)
        x = jax.random.normal(kx, (B, C, H, W), jnp.float32).astype(dtype)
        # PyTorch-style uniform(-1/sqrt(fan_in), +1/sqrt(fan_in)).
        lim1 = 1.0 / (C ** 0.5)
        lim2 = 1.0 / (Ch ** 0.5)
        w1 = jax.random.uniform(k1, (Ch, C), jnp.float32, -lim1, lim1)
        b1 = jax.random.uniform(k2, (Ch,), jnp.float32, -lim1, lim1)
        w2 = jax.random.uniform(k3, (C, Ch), jnp.float32, -lim2, lim2)
        b2 = jax.random.uniform(k4, (C,), jnp.float32, -lim2, lim2)
        return x, w1, b1, w2, b2

    def check(out, x, w1, b1, w2, b2, tol):
        ref = _reference(x, w1, b1, w2, b2)
        assert out.shape == x.shape
        assert jnp.allclose(out.astype(jnp.float32), ref, atol=tol, rtol=tol), \
            "mismatch vs reference"

    k0, k1, k2, k3 = jax.random.split(root, 4)

    # 1) Fused path, f32, VPU excitation (C=64, reduction 16, HW=256).
    args = make_inputs(k0, 2, 64, 4, 16, 16)
    out = jax.block_until_ready(channel_importance(*args))
    check(out, *args, tol=1e-5)

    # 2) Fused path, MXU excitation + non-128-aligned HW (C=256, HW=64; no pad).
    args = make_inputs(k1, 4, 256, 16, 8, 8)
    out = jax.block_until_ready(channel_importance(*args))
    check(out, *args, tol=1e-5)

    # 3) Fused path, bf16 activations (f32 math inside the kernel).
    args = make_inputs(k2, 2, 64, 4, 16, 16, dtype=jnp.bfloat16)
    out = jax.block_until_ready(channel_importance(*args))
    check(out, *args, tol=3e-2)

    # 4) Two-pass fallback (forced tiny budget; exercises partial row blocks).
    args = make_inputs(k3, 3, 36, 9, 10, 10)
    out = jax.block_until_ready(
        channel_importance(*args, tile_budget_bytes=8 << 10))
    check(out, *args, tol=1e-5)

    print("KERNEL_OK")
</pallas_src>

<mosaic_0001>
module attributes {stable_mosaic.version = 11 : i64} {
  func.func @_se_fused_kernel(%arg0: i32, %arg1: memref<1x64x256xf32, #tpu.memory_space<vmem>>, %arg2: memref<4x64xf32, #tpu.memory_space<vmem>>, %arg3: memref<1x4xf32, #tpu.memory_space<vmem>>, %arg4: memref<64x4xf32, #tpu.memory_space<vmem>>, %arg5: memref<1x64xf32, #tpu.memory_space<vmem>>, %arg6: memref<1x64x256xf32, #tpu.memory_space<vmem>>) attributes {dimension_semantics = [#tpu.dimension_semantics<parallel>], iteration_bounds = array<i64: 2>, scalar_prefetch = 0 : i64, scratch_operands = 0 : i64, tpu.core_type = #tpu.core_type<tc>, window_params = [{transform_indices = @transform_0, window_bounds = array<i64: 1, 64, 256>}, {pipeline_mode = #tpu.pipeline_mode<synchronous>, transform_indices = @transform_1, window_bounds = array<i64: 4, 64>}, {pipeline_mode = #tpu.pipeline_mode<synchronous>, transform_indices = @transform_2, window_bounds = array<i64: 1, 4>}, {pipeline_mode = #tpu.pipeline_mode<synchronous>, transform_indices = @transform_3, window_bounds = array<i64: 64, 4>}, {pipeline_mode = #tpu.pipeline_mode<synchronous>, transform_indices = @transform_4, window_bounds = array<i64: 1, 64>}, {transform_indices = @transform_5, window_bounds = array<i64: 1, 64, 256>}]} {
    %c0 = arith.constant 0 : index
    %c0_0 = arith.constant 0 : index
    %c0_1 = arith.constant 0 : index
    %0 = vector.load %arg1[%c0, %c0_0, %c0_1] : memref<1x64x256xf32, #tpu.memory_space<vmem>>, vector<1x64x256xf32>
    %cst = arith.constant dense<0.000000e+00> : vector<1x64xf32>
    %1 = vector.multi_reduction <add>, %0, %cst [2] : vector<1x64x256xf32> to vector<1x64xf32>
    %cst_2 = arith.constant 3.906250e-03 : f32
    %2 = vector.broadcast %cst_2 : f32 to vector<1x64xf32>
    %3 = arith.mulf %1, %2 : vector<1x64xf32>
    %c0_3 = arith.constant 0 : index
    %c0_4 = arith.constant 0 : index
    %4 = vector.load %arg2[%c0_3, %c0_4] : memref<4x64xf32, #tpu.memory_space<vmem>>, vector<4x64xf32>
    %c0_5 = arith.constant 0 : index
    %c0_6 = arith.constant 0 : index
    %5 = vector.load %arg3[%c0_5, %c0_6] : memref<1x4xf32, #tpu.memory_space<vmem>>, vector<1x4xf32>
    %c0_7 = arith.constant 0 : index
    %c0_8 = arith.constant 0 : index
    %6 = vector.load %arg4[%c0_7, %c0_8] : memref<64x4xf32, #tpu.memory_space<vmem>>, vector<64x4xf32>
    %c0_9 = arith.constant 0 : index
    %c0_10 = arith.constant 0 : index
    %7 = vector.load %arg5[%c0_9, %c0_10] : memref<1x64xf32, #tpu.memory_space<vmem>>, vector<1x64xf32>
    %8 = vector.shape_cast %4 : vector<4x64xf32> to vector<1x4x64xf32>
    %9 = vector.shape_cast %3 : vector<1x64xf32> to vector<1x1x64xf32>
    %10 = vector.broadcast %9 : vector<1x1x64xf32> to vector<1x4x64xf32>
    %11 = arith.mulf %8, %10 : vector<1x4x64xf32>
    %cst_11 = arith.constant dense<0.000000e+00> : vector<1x4xf32>
    %12 = vector.multi_reduction <add>, %11, %cst_11 [2] : vector<1x4x64xf32> to vector<1x4xf32>
    %13 = arith.addf %12, %5 : vector<1x4xf32>
    %cst_12 = arith.constant 0.000000e+00 : f32
    %14 = vector.broadcast %cst_12 : f32 to vector<1x4xf32>
    %15 = arith.maximumf %13, %14 : vector<1x4xf32>
    %16 = vector.shape_cast %6 : vector<64x4xf32> to vector<1x64x4xf32>
    %17 = vector.shape_cast %15 : vector<1x4xf32> to vector<1x1x4xf32>
    %18 = vector.broadcast %17 : vector<1x1x4xf32> to vector<1x64x4xf32>
    %19 = arith.mulf %16, %18 : vector<1x64x4xf32>
    %cst_13 = arith.constant dense<0.000000e+00> : vector<1x64xf32>
    %20 = vector.multi_reduction <add>, %19, %cst_13 [2] : vector<1x64x4xf32> to vector<1x64xf32>
    %21 = arith.addf %20, %7 : vector<1x64xf32>
    %22 = arith.negf %21 : vector<1x64xf32>
    %23 = math.exp %22 : vector<1x64xf32>
    %cst_14 = arith.constant 1.000000e+00 : f32
    %24 = vector.broadcast %cst_14 : f32 to vector<1x64xf32>
    %25 = arith.addf %24, %23 : vector<1x64xf32>
    %26 = arith.divf %24, %25 : vector<1x64xf32>
    %c0_15 = arith.constant 0 : index
    %c0_16 = arith.constant 0 : index
    %c0_17 = arith.constant 0 : index
    %27 = vector.load %arg1[%c0_15, %c0_16, %c0_17] : memref<1x64x256xf32, #tpu.memory_space<vmem>>, vector<1x64x256xf32>
    %28 = vector.shape_cast %26 : vector<1x64xf32> to vector<1x64x1xf32>
    %29 = vector.broadcast %28 : vector<1x64x1xf32> to vector<1x64x256xf32>
    %30 = arith.mulf %27, %29 : vector<1x64x256xf32>
    %c0_18 = arith.constant 0 : index
    %c0_19 = arith.constant 0 : index
    %c0_20 = arith.constant 0 : index
    %31 = vector.load %arg6[%c0_18, %c0_19, %c0_20] : memref<1x64x256xf32, #tpu.memory_space<vmem>>, vector<1x64x256xf32>
    tpu.vector_store %arg6[%c0_18, %c0_19, %c0_20], %30 {strides = array<i32>} : memref<1x64x256xf32, #tpu.memory_space<vmem>>, vector<1x64x256xf32>,
    return
  }
  func.func @transform_0(%arg0: i32) -> (i32, i32, i32) {
    %c0_i32 = arith.constant 0 : i32
    %c0_i32_0 = arith.constant 0 : i32
    %c0_i32_1 = arith.constant 0 : i32
    return %arg0, %c0_i32, %c0_i32_0 : i32, i32, i32
  }
  func.func @transform_1(%arg0: i32) -> (i32, i32) {
    %c0_i32 = arith.constant 0 : i32
    %c0_i32_0 = arith.constant 0 : i32
    %c0_i32_1 = arith.constant 0 : i32
    return %c0_i32, %c0_i32_0 : i32, i32
  }
  func.func @transform_2(%arg0: i32) -> (i32, i32) {
    %c0_i32 = arith.constant 0 : i32
    %c0_i32_0 = arith.constant 0 : i32
    %c0_i32_1 = arith.constant 0 : i32
    return %c0_i32, %c0_i32_0 : i32, i32
  }
  func.func @transform_3(%arg0: i32) -> (i32, i32) {
    %c0_i32 = arith.constant 0 : i32
    %c0_i32_0 = arith.constant 0 : i32
    %c0_i32_1 = arith.constant 0 : i32
    return %c0_i32, %c0_i32_0 : i32, i32
  }
  func.func @transform_4(%arg0: i32) -> (i32, i32) {
    %c0_i32 = arith.constant 0 : i32
    %c0_i32_0 = arith.constant 0 : i32
    %c0_i32_1 = arith.constant 0 : i32
    return %c0_i32, %c0_i32_0 : i32, i32
  }
  func.func @transform_5(%arg0: i32) -> (i32, i32, i32) {
    %c0_i32 = arith.constant 0 : i32
    %c0_i32_0 = arith.constant 0 : i32
    %c0_i32_1 = arith.constant 0 : i32
    return %arg0, %c0_i32, %c0_i32_0 : i32, i32, i32
  }
}

</mosaic_0001>

<bundles_post_ra>
// kernel: tpu_custom_call.1
= control target key start
LH: loop header
LB: loop body
LE: loop exit
PB: predicated region body
PF: predicated region fallthrough
CT: control target
= control target key end

     0   :  { %10 = vsyncpa [#allocation3], 0  ;;  %s1399_s0 = inlined_call_operand.hbm [shape: f32[2,64,256], index: 0, kind: input, shape index: {}]   ;;  %s1400_s1 = inlined_call_operand.vmem [shape: f32[4,64], index: 1, kind: input, shape index: {}]   ;;  %s1401_s2 = inlined_call_operand.vmem [shape: f32[1,4], index: 2, kind: input, shape index: {}]   ;;  %s1402_s3 = inlined_call_operand.vmem [shape: f32[64,4], index: 3, kind: input, shape index: {}]   ;;  %s1403_s4 = inlined_call_operand.vmem [shape: f32[1,64], index: 4, kind: input, shape index: {}]   ;;  %s1404_s5 = inlined_call_operand.hbm [shape: f32[2,64,256], index: 5, kind: output, shape index: {}]  }
   0x1   :  { %12 = vsyncpa [#allocation3 + $0x1], 0 }
   0x2   :  { %13 = vsyncpa [#allocation4], 0 }
   0x3   :  { %15 = vsyncpa [#allocation4 + $0x1], 0  ;;  %s1047_s18 = smov 0   ;;  %s1049_s19 = smov 0  }
   0x4   :  { %s1051_s20 = smov 0   ;;  %s1053_s21 = smov 0  }
   0x5 LB: > { %s1068_s22 = sadd.s32 4294967295, %s1010_s21   ;;  %s792_s23 = sadd.s32 4294967294, %s1010_s21   ;;  %s1010_s21 = sphi %s1053_s21, %s1416_s21   ;;  %s1006_s20 = sphi %s1051_s20, %s1415_s20   ;;  %s1002_s19 = sphi %s1049_s19, %s1414_s19   ;;  %s998_s18 = sphi %s1047_s18, %s1413_s18  }
   0x6   : > { %s1072_s24 = sadd.s32 1, %s1010_s21   ;;  %s28_s25 = sadd.s32 1, %s1006_s20 }
   0x7   : > { %s25_s26 = ssub.s32 %s1010_s21, %s1072_s24  ;;  %p35_p0 = scmp.ne.s32.totalorder %s1006_s20, %s1002_s19 }
   0x8   : > { %p26_p1 = scmp.eq.s32.totalorder %s25_s26, 0  ;;  %p36_p2 = scmp.eq.s32.totalorder %s1010_s21, 0 }
   0x9   : > { %p41_p3 = scmp.ne.s32.totalorder %s1002_s19, %s998_s18  ;;  %p42_p4 = scmp.eq.s32.totalorder %s1068_s22, 0 }
   0xa   : > { %s1084_s27 = scalar_select %p26_p1, %s1006_s20, %s28_s25  }
   0xb   : > { %p1086_p5 = por %p36_p2, %p35_p0  ;;  %p1090_p6 = por %p42_p4, %p41_p3 }
   0xc   : > { %p149_p7 = scmp.eq.s32.totalorder %s1068_s22, 1  ;;  %p155_p8 = scmp.eq.s32.totalorder %s792_s23, 1 }
   0xd   : > { %p828_p10 = scmp.lt.s32.totalorder %s1010_s21, 2  ;;  %s187_s7 = sand.u32 1, %s1006_s20  }
   0xe   : > { %p1097_p11 = por %p149_p7, %p35_p0  ;;  %p1101_p12 = por %p155_p8, %p41_p3 }
   0xf   : > { %s814_s8 = sshll.u32 %s1010_s21, 7  ;;  %s795_s9 = sshll.u32 %s187_s7, 7 }
  0x10   : > { %s196_s12 = scalar_lea.hbm %s1399_s0, %s814_s8  ;;  %s191_s14 = scalar_lea.vmem [#allocation2], %s795_s9 }
  0x11   : > { %s197_s13 = sshll.u32 %s196_s12, 4  ;;  %s199_s15 = sshll.u32 %s191_s14, 4  ;;  %s198_s13 = int_to_ptr.hbm [resolvable:$true] %s197_s13  ;;  %s200_s15 = int_to_ptr.vmem [resolvable:$true] %s199_s15 }
  0x12   : > { %p1112_p13 = pnand %p828_p10, %p1086_p5  ;;  %p798_p0 = scmp.ge.s32.totalorder %s1010_s21, 1 }
  0x13   : > { %p207_p1 = scmp.lt.s32.totalorder %s1010_s21, 3  ;;  %s188_s17 = scalar_lea.sflag [#allocation3], %s187_s7 }
  0x14   : > { %s914_s23 = sshra.s32 %s198_s13, 4  ;;  %p918_p3 = pneg %p1112_p13  ;;  %s915_s23 = int_to_ptr.hbm [resolvable:$true] %s914_s23 }
  0x15   : > { %s916_s25 = scalar_lea.hbm %s915_s23, 128  ;;  %s921_s28 = scalar_lea.hbm %s1399_s0, 256 }
  0x16   : > { %p917_p2 = scmp.ne.s32.totalorder %s915_s23, %s916_s25  ;;  %p922_p5 = scmp.lt.s32.totalorder %s915_s23, %s1399_s0 }
  0x17   : > { %p923_p8 = scmp.lt.s32.totalorder %s921_s28, %s916_s25 }
  0x18   : > { %p919_p4 = pnand %p918_p3, %p917_p2 }
  0x19   : > { %p924_p10 = por %p923_p8, %p922_p5 }
  0x1a   : > { %p920_p7 = pneg %p919_p4 }
  0x1c   : > { %p925_p9 = pnand %p924_p10, %p920_p7 }
  0x1e   : > { %928 = shalt.err (!%p925_p9)
}
  0x1f   : > { %s1012_s7 = smov 256   ;;  %s1013_s11 = smov 16  }
  0x20   : > { %823 = dma.hbm_to_vmem [thread:$0]  (!%p1112_p13), %s198_s13, 2048, %s200_s15, %s188_s17, %s1012_s7, %s1012_s7, %s1013_s11  }
  0x21   : > { %p208_p2 = pnand %p798_p0, %p207_p1 }
  0x22   : > { %s1133_s12 = sand.u32 (!%p208_p2), 1, %s1002_s19  }
  0x23   : > { %211 = sbr.rel (%p208_p2) target bundleno = 800 (0x320), region = 40  ;;  %s799_s14 = sshll.u32 (!%p208_p2), %s1133_s12, 7 }
  0x24   : > { %s214_s23 = scalar_lea.sflag (!%p208_p2), [#allocation3], %s1133_s12  ;;  %s1139_s25 = scalar_lea.vmem (!%p208_p2), [#allocation2], %s799_s14 }
  0x28   : > { %989 = dma.done.wait (%p1090_p6), %s214_s23, 2048  }
  0x29   : > { %991 = vsyncadd (%p1090_p6), %s214_s23, 4294965248  ;;  %v312_v0 = vlaneseq  ;;  %v1150_v2 = vld [vmem:[%s1139_s25] sm:$0xff]  ;;  %v1153_v3 = vld [vmem:[%s1139_s25 + $0x8] sm:$0xff]  ;;  %vm317_vm0 = vcmask 130112   ;;  %vm321_vm1 = vcmask 195712   ;;  %vm325_vm2 = vcmask 261312  }
  0x2a   : > { %v1156_v4 = vld [vmem:[%s1139_s25 + $0x20] sm:$0xff]  ;;  %v261_v5 = vadd.f32 %v1153_v3, %v1150_v2  ;;  %v1161_v6 = vld [vmem:[%s1139_s25 + $0x28] sm:$0xff]  ;;  %v1174_v11 = vld [vmem:[%s1139_s25 + $0x10] sm:$0xff]  ;;  %vm329_vm3 = vcmask 326912   ;;  %vm333_vm4 = vcmask 392512   ;;  %vm337_vm5 = vcmask 458112  }
  0x2b   : > { %v1145_v1 = vshrl.u32 %v312_v0, 7  ;;  %v1164_v7 = vld [vmem:[%s1139_s25 + $0x40] sm:$0xff]  ;;  %v1167_v8 = vld [vmem:[%s1139_s25 + $0x48] sm:$0xff]  ;;  %v267_v9 = vadd.f32 %v1161_v6, %v1156_v4  ;;  %v1177_v12 = vld [vmem:[%s1139_s25 + $0x18] sm:$0xff]  ;;  %v1226_v33 = vand.u32 127, %v312_v0  ;;  %vm341_vm6 = vcmask 523712  }
  0x2c   : > { %v273_v10 = vadd.f32 %v1167_v8, %v1164_v7  ;;  %262 = vadd.xlane.f32.xlu0 %v261_v5  ;;  %v1180_v13 = vld [vmem:[%s1139_s25 + $0x30] sm:$0xff]  ;;  %v1183_v14 = vld [vmem:[%s1139_s25 + $0x38] sm:$0xff]  ;;  %v264_v17 = vadd.f32 %v1177_v12, %v1174_v11  ;;  %v1198_v20 = vld [vmem:[%s1139_s25 + $0x60] sm:$0xff]  ;;  %vm349_vm7 = vcmask 519168   ;;  %vm388_vm8 = vcmask 31744   ;;  %s1333_s9 = scalar_lea.vmem [#allocation5], %s799_s14 }
  0x2d   : > { %868 = vset.pattern.permute.xlu2 %v1145_v1  ;;  %867 = vset.pattern.permute.xlu0 %v1145_v1  ;;  %v1186_v15 = vld [vmem:[%s1139_s25 + $0x50] sm:$0xff]  ;;  %v1189_v16 = vld [vmem:[%s1139_s25 + $0x58] sm:$0xff]  ;;  %v270_v18 = vadd.f32 %v1183_v14, %v1180_v13  ;;  %v1201_v21 = vld [vmem:[%s1139_s25 + $0x68] sm:$0xff]  ;;  %v429_v27 = vadd.s32 16, %v1145_v1  ;;  %v435_v28 = vadd.s32 24, %v1145_v1  ;;  %v315_v35 = vadd.s32 4294967288, %v1226_v33 }
  0x2e   : > { %268 = vadd.xlane.f32.xlu1 %v267_v9  ;;  %274 = vadd.xlane.f32.xlu2 %v273_v10  ;;  %v276_v19 = vadd.f32 %v1189_v16, %v1186_v15  ;;  %v1204_v22 = vld [vmem:[%s1139_s25 + $0x70] sm:$0xff]  ;;  %v1207_v23 = vld [vmem:[%s1139_s25 + $0x78] sm:$0xff]  ;;  %v279_v24 = vadd.f32 %v1201_v21, %v1198_v20  ;;  %v1216_v26 = vld [vmem:[%s1403_s4] ss:$0 sm:$0xff]  ;;  %v319_v36 = vadd.s32 4294967280, %v1226_v33  ;;  %v323_v39 = vadd.s32 4294967272, %v1226_v33 }
  0x2f   : > { %v282_v25 = vadd.f32 %v1207_v23, %v1204_v22  ;;  %v881_v29 = vld [vmem:[%s1401_s2] ss:$0 sm:$0xff]  ;;  %v423_v40 = vadd.s32 8, %v1145_v1  ;;  %v327_v44 = vadd.s32 4294967264, %v1226_v33  ;;  %v331_v51 = vadd.s32 4294967256, %v1226_v33  ;;  %s815_s14 = sshll.u32 %s1068_s22, 7 }
  0x30   : > { %v335_v57 = vadd.s32 4294967248, %v1226_v33  ;;  %v339_v60 = vadd.s32 4294967240, %v1226_v33  ;;  %s715_s11 = scalar_lea.hbm %s1404_s5, %s815_s14  ;;  %s716_s23 = sshll.u32 %s1333_s9, 4  ;;  %s717_s23 = int_to_ptr.vmem [resolvable:$true] %s716_s23 }
  0x31   : > { %869 = vset.pattern.permute.xlu1 %v423_v40  ;;  %v301_v40 = vld [vmem:[%s1402_s3 + $0x30] sm:$0xff]  ;;  %s718_s25 = sshll.u32 %s715_s11, 4  ;;  %s704_s29 = scalar_lea.sflag [#allocation4], %s1133_s12  ;;  %s719_s25 = int_to_ptr.hbm [resolvable:$true] %s718_s25 }
  0x32   : > { %s958_s13 = sshra.s32 %s719_s25, 4  ;;  %s964_s17 = scalar_lea.hbm %s1404_s5, 256  ;;  %s959_s13 = int_to_ptr.hbm [resolvable:$true] %s958_s13 }
  0x33   : > { %s960_s22 = scalar_lea.hbm %s959_s13, 128  ;;  %p965_p0 = scmp.lt.s32.totalorder %s959_s13, %s1404_s5 }
  0x34   : > { %265 = vadd.xlane.f32.xlu0 %v264_v17  ;;  %v293_v17 = vld [vmem:[%s1400_s1] sm:$0xf]  ;;  %p961_p6 = scmp.ne.s32.totalorder %s959_s13, %s960_s22  ;;  %p966_p1 = scmp.lt.s32.totalorder %s964_s17, %s960_s22 }
  0x36   : > { %271 = vadd.xlane.f32.xlu1 %v270_v18  ;;  %277 = vadd.xlane.f32.xlu2 %v276_v19  ;;  %p962_p9 = pnand %p961_p6, %p1097_p11  ;;  %p967_p3 = por %p966_p1, %p965_p0 }
  0x38   : > { %p963_p13 = pneg %p962_p9 }
  0x3a   : > { %p968_p4 = pnand %p967_p3, %p963_p13 }
  0x3c   : > { %280 = vadd.xlane.f32.xlu0 %v279_v24 }
  0x3e   : > { %283 = vadd.xlane.f32.xlu1 %v282_v25 }
  0x4e   : > { %419 = vperm.xlu2 %868, %v1216_v26  }
  0x50   : > { %359 = vperm.xlu0 %867, %v881_v29  }
  0x56   : > { %870 = vset.pattern.permute.xlu2 %v429_v27  ;;  %v1014_v27 = vmov 0  }
  0x57   : > { %425 = vperm.xlu1 %869, %v1216_v26  }
  0x5e   : > { %431 = vperm.xlu2 %870, %v1216_v26  }
  0x5f   : > { %872 = vset.pattern.permute.xlu1 %v1014_v27 }
  0x66   : > { %871 = vset.pattern.permute.xlu2 %v435_v28 }
  0x6e   : > { %437 = vperm.xlu2 %871, %v1216_v26  }
  0x9f   : > { %v263_v30 = vpop.xlane.xlu0 %262 }
  0xa0   : > { %v285_v34 = vmul.f32 0.00390625, %v263_v30 }
  0xa1   : > { %v269_v31 = vpop.xlane.xlu1 %268  ;;  %v275_v32 = vpop.xlane.xlu2 %274 }
  0xa2   : > { %v287_v37 = vmul.f32 0.00390625, %v269_v31  ;;  %v314_v46 = vperm.slane %v285_v34, %v1226_v33  ;;  %v289_v47 = vmul.f32 0.00390625, %v275_v32 }
  0xa4   : > { %v320_v49 = vperm.slane %v287_v37, %v319_v36  ;;  %v328_v55 = vperm.slane %v289_v47, %v327_v44  ;;  %v441_v36 = vadd.s32 32, %v1145_v1  ;;  %v302_v44 = vld [vmem:[%s1402_s3 + $0x38] sm:$0xff] }
  0xa6   : > { %873 = vset.pattern.permute.xlu0 %v441_v36 }
  0xa7   : > { %v266_v38 = vpop.xlane.xlu0 %265 }
  0xa8   : > { %v286_v41 = vmul.f32 0.00390625, %v266_v38  ;;  %v453_v38 = vadd.s32 48, %v1145_v1 }
  0xa9   : > { %v272_v42 = vpop.xlane.xlu1 %271  ;;  %v278_v43 = vpop.xlane.xlu2 %277 }
  0xaa   : > { %v288_v45 = vmul.f32 0.00390625, %v272_v42  ;;  %v316_v48 = vperm.slane %v286_v41, %v315_v35  ;;  %v290_v52 = vmul.f32 0.00390625, %v278_v43  ;;  %v299_v41 = vld [vmem:[%s1402_s3 + $0x20] sm:$0xff] }
  0xab   : > { %v295_v42 = vld [vmem:[%s1402_s3] sm:$0xff] }
  0xac   : > { %v324_v50 = vperm.slane %v288_v45, %v323_v39  ;;  %v318_v53 = vsel %vm317_vm0, %v316_v48, %v314_v46  ;;  %v332_v58 = vperm.slane %v290_v52, %v331_v51 }
  0xad   : > { %v322_v54 = vsel %vm321_vm1, %v320_v49, %v318_v53  ;;  %v447_v53 = vadd.s32 40, %v1145_v1 }
  0xae   : > { %v326_v56 = vsel %vm325_vm2, %v324_v50, %v322_v54 }
  0xaf   : > { %v281_v59 = vpop.xlane.xlu0 %280  ;;  %v330_v61 = vsel %vm329_vm3, %v328_v55, %v326_v56  ;;  %874 = vset.pattern.permute.xlu2 %v447_v53  ;;  %v297_v56 = vld [vmem:[%s1402_s3 + $0x10] sm:$0xff] }
  0xb0   : > { %v291_v62 = vmul.f32 0.00390625, %v281_v59  ;;  %v334_v9 = vsel %vm333_vm4, %v332_v58, %v330_v61  ;;  %v298_v59 = vld [vmem:[%s1402_s3 + $0x18] sm:$0xff] }
  0xb1   : > { %v284_v63 = vpop.xlane.xlu1 %283  ;;  %v420_v28 = vpop.permute.xlu2 %419 }
  0xb2   : > { %v292_v0 = vmul.f32 0.00390625, %v284_v63  ;;  %v336_v5 = vperm.slane %v291_v62, %v335_v57  ;;  %v300_v62 = vld [vmem:[%s1402_s3 + $0x28] sm:$0xff] }
  0xb4   : > { %v340_v10 = vperm.slane %v292_v0, %v339_v60  ;;  %v338_v18 = vsel %vm337_vm5, %v336_v5, %v334_v9  ;;  %v459_v5 = vadd.s32 56, %v1145_v1 }
  0xb6   : > { %v342_v19 = vsel %vm341_vm6, %v340_v10, %v338_v18 }
  0xb7   : > { %v348_v24 = vmul.f32 %v342_v19, %v293_v17 }
  0xb9   : > { %v350_v25 = vsel %vm349_vm7, %v348_v24, 0.0  ;;  %v1242_v29 = vpop.permute.xlu2 %431 }
  0xba   : > { %351 = vadd.xlane.f32.xlu2 %v350_v25 }
  0xc2   : > { %v360_v31 = vpop.permute.xlu0 %359 }
  0xc8   : > { %v1244_v30 = vpop.permute.xlu2 %437 }
  0xc9   : > { %v426_v37 = vpop.permute.xlu1 %425 }
 0x12d   : > { %v352_v32 = vpop.xlane.xlu2 %351 }
 0x12e   : > { %v362_v34 = vadd.f32 %v360_v31, %v352_v32 }
 0x130   : > { %v363_v35 = vmax.f32 %v362_v34, 0.0 }
 0x132   : > { %366 = vperm.xlu1 %872, %v363_v35  }
 0x13a   : > { %875 = vset.pattern.permute.xlu1 %v453_v38 }
 0x1a4   : > { %v367_v39 = vpop.permute.xlu1 %366 }
 0x1a5   : > { %v368_v43 = vperm.slane %v367_v39, %v1226_v33  ;;  %v296_v33 = vld [vmem:[%s1402_s3 + $0x8] sm:$0xff] }
 0x1a7   : > { %v386_v45 = vmul.f32 %v368_v43, %v301_v40  ;;  %v384_v46 = vmul.f32 %v368_v43, %v299_v41  ;;  %v380_v47 = vmul.f32 %v368_v43, %v295_v42  ;;  %v387_v48 = vmul.f32 %v368_v43, %v302_v44 }
 0x1a8   : > { %v381_v54 = vmul.f32 %v368_v43, %v296_v33  ;;  %v382_v57 = vmul.f32 %v368_v43, %v297_v56  ;;  %v383_v60 = vmul.f32 %v368_v43, %v298_v59  ;;  %v385_v63 = vmul.f32 %v368_v43, %v300_v62 }
 0x1a9   : > { %v407_v49 = vsel %vm388_vm8, %v386_v45, 0.0  ;;  %v401_v50 = vsel %vm388_vm8, %v384_v46, 0.0  ;;  %v389_v51 = vsel %vm388_vm8, %v380_v47, 0.0  ;;  %v410_v52 = vsel %vm388_vm8, %v387_v48, 0.0 }
 0x1aa   : > { %408 = vadd.xlane.f32.xlu0 %v407_v49  ;;  %402 = vadd.xlane.f32.xlu1 %v401_v50  ;;  %v392_v55 = vsel %vm388_vm8, %v381_v54, 0.0  ;;  %v395_v58 = vsel %vm388_vm8, %v382_v57, 0.0  ;;  %v398_v61 = vsel %vm388_vm8, %v383_v60, 0.0  ;;  %v404_v0 = vsel %vm388_vm8, %v385_v63, 0.0 }
 0x1ab   : > { %390 = vadd.xlane.f32.xlu2 %v389_v51 }
 0x1b3   : > { %393 = vadd.xlane.f32.xlu2 %v392_v55 }
 0x1bb   : > { %396 = vadd.xlane.f32.xlu2 %v395_v58 }
 0x1be   : > { %443 = vperm.xlu0 %873, %v1216_v26  }
 0x1c3   : > { %399 = vadd.xlane.f32.xlu2 %v398_v61  ;;  %455 = vperm.xlu1 %875, %v1216_v26  }
 0x1c6   : > { %879 = vset.pattern.permute.xlu0 %v1014_v27 }
 0x1cb   : > { %405 = vadd.xlane.f32.xlu2 %v404_v0  ;;  %877 = vset.pattern.permute.xlu1 %v1014_v27 }
 0x1e3   : > { %449 = vperm.xlu2 %874, %v1216_v26  }
 0x1eb   : > { %876 = vset.pattern.permute.xlu2 %v459_v5 }
 0x20c   : > { %411 = vadd.xlane.f32.xlu2 %v410_v52 }
 0x21d   : > { %v409_v24 = vpop.xlane.xlu0 %408  ;;  %v403_v34 = vpop.xlane.xlu1 %402 }
 0x21e   : > { %v391_v9 = vpop.xlane.xlu2 %390 }
 0x21f   : > { %v471_v10 = vadd.f32 %v420_v28, %v391_v9 }
 0x221   : > { %v801_v17 = vmul.f32 -1.442695, %v471_v10 }
 0x223   : > { %882 = vpow2.f32 %v801_v17 }
 0x224   : > { %461 = vperm.xlu2 %876, %v1216_v26  }
 0x226   : > { %v394_v18 = vpop.xlane.xlu2 %393 }
 0x227   : > { %v472_v19 = vadd.f32 %v426_v37, %v394_v18 }
 0x229   : > { %v883_v25 = vpop.eup %882  ;;  %v802_v31 = vmul.f32 -1.442695, %v472_v19 }
 0x22a   : > { %v503_v32 = vadd.f32 1.0, %v883_v25 }
 0x22b   : > { %884 = vpow2.f32 %v802_v31 }
 0x22c   : > { %886 = vrcp.f32 %v503_v32  ;;  %878 = vset.pattern.permute.xlu2 %v1014_v27  ;;  %v522_v27 = vand.u32 2147483648, %v503_v32  ;;  %vm516_vm10 = vweird.f32 %v503_v32 }
 0x22e   : > { %v397_v1 = vpop.xlane.xlu2 %396  ;;  %v523_v53 = vor.u32 1.1754944e-38, %v522_v27 }
 0x22f   : > { %v473_v35 = vadd.f32 %v1242_v29, %v397_v1  ;;  %v520_v29 = vand.u32 2147483647, %v503_v32 }
 0x230   : > { %v444_v36 = vpop.permute.xlu0 %443 }
 0x231   : > { %v885_v28 = vpop.eup %884  ;;  %v803_v38 = vmul.f32 -1.442695, %v473_v35  ;;  %v475_v39 = vadd.f32 %v444_v36, %v403_v34  ;;  %vm521_vm12 = vcmp.eq.f32.partialorder %v520_v29, 8.507059e+37 }
 0x232   : > { %v887_v40 = vpop.eup %886  ;;  %v504_v26 = vadd.f32 1.0, %v885_v28 }
 0x233   : > { %888 = vpow2.f32 %v803_v38  ;;  %v805_v37 = vmul.f32 -1.442695, %v475_v39  ;;  %v512_v41 = vmul.f32 %v887_v40, %v503_v32  ;;  %vm517_vm9 = vweird.f32 %v887_v40 }
 0x234   : > { %890 = vrcp.f32 %v504_v26  ;;  %vm518_vm11 = vmor %vm516_vm10, %vm517_vm9  ;;  %v537_v60 = vand.u32 2147483648, %v504_v26  ;;  %v535_v62 = vand.u32 2147483647, %v504_v26  ;;  %vm531_vm14 = vweird.f32 %v504_v26 }
 0x235   : > { %892 = vpow2.f32 %v805_v37  ;;  %v456_v42 = vpop.permute.xlu1 %455  ;;  %v513_v43 = vsub.f32 1.0, %v512_v41 }
 0x236   : > { %v477_v44 = vadd.f32 %v456_v42, %v409_v24  ;;  %v400_v45 = vpop.xlane.xlu2 %399  ;;  %v538_v18 = vor.u32 1.1754944e-38, %v537_v60  ;;  %vm536_vm0 = vcmp.eq.f32.partialorder %v535_v62, 8.507059e+37 }
 0x237   : > { %v474_v46 = vadd.f32 %v1244_v30, %v400_v45  ;;  %v514_v47 = vmul.f32 %v887_v40, %v513_v43 }
 0x238   : > { %v807_v48 = vmul.f32 -1.442695, %v477_v44 }
 0x239   : > { %v889_v49 = vpop.eup %888  ;;  %v804_v50 = vmul.f32 -1.442695, %v474_v46  ;;  %v515_v51 = vadd.f32 %v887_v40, %v514_v47 }
 0x23a   : > { %v891_v52 = vpop.eup %890  ;;  %v505_v33 = vadd.f32 1.0, %v889_v49  ;;  %894 = vpow2.f32 %v807_v48 }
 0x23b   : > { %v893_v54 = vpop.eup %892  ;;  %896 = vpow2.f32 %v804_v50  ;;  %v519_v55 = vsel %vm518_vm11, %v887_v40, %v515_v51  ;;  %v527_v56 = vmul.f32 %v891_v52, %v504_v26  ;;  %vm532_vm13 = vweird.f32 %v891_v52 }
 0x23c   : > { %898 = vrcp.f32 %v505_v33  ;;  %v1292_v30 = vadd.f32 1.0, %v893_v54  ;;  %v524_v57 = vsel %vm521_vm12, %v523_v53, %v519_v55  ;;  %vm533_vm15 = vmor %vm531_vm14, %vm532_vm13  ;;  %v550_v35 = vand.u32 2147483647, %v505_v33 }
 0x23d   : > { %633 = vperm.xlu1 %877, %v524_v57   ;;  %v528_v58 = vsub.f32 1.0, %v527_v56  ;;  %v552_v36 = vand.u32 2147483648, %v505_v33  ;;  %vm546_vm2 = vweird.f32 %v505_v33 }
 0x23e   : > { %900 = vrcp.f32 %v1292_v30  ;;  %v406_v59 = vpop.xlane.xlu2 %405  ;;  %vm551_vm4 = vcmp.eq.f32.partialorder %v550_v35, 8.507059e+37  ;;  %vm576_vm5 = vweird.f32 %v1292_v30  ;;  %v582_v29 = vand.u32 2147483648, %v1292_v30 }
 0x23f   : > { %v529_v61 = vmul.f32 %v891_v52, %v528_v58  ;;  %v553_v43 = vor.u32 1.1754944e-38, %v552_v36  ;;  %v580_v53 = vand.u32 2147483647, %v1292_v30 }
 0x240   : > { %v895_v63 = vpop.eup %894  ;;  %v583_v58 = vor.u32 1.1754944e-38, %v582_v29 }
 0x241   : > { %v897_v0 = vpop.eup %896  ;;  %v1295_v5 = vadd.f32 1.0, %v895_v63  ;;  %v530_v9 = vadd.f32 %v891_v52, %v529_v61 }
 0x242   : > { %v899_v10 = vpop.eup %898  ;;  %v1297_v17 = vadd.f32 1.0, %v897_v0 }
 0x243   : > { %902 = vrcp.f32 %v1295_v5  ;;  %v534_v19 = vsel %vm533_vm15, %v891_v52, %v530_v9  ;;  %v542_v24 = vmul.f32 %v899_v10, %v505_v33  ;;  %vm547_vm1 = vweird.f32 %v899_v10 }
 0x244   : > { %v1300_v25 = vpop.eup %900  ;;  %904 = vrcp.f32 %v1297_v17  ;;  %v539_v31 = vsel %vm536_vm0, %v538_v18, %v534_v19  ;;  %vm548_vm3 = vmor %vm546_vm2, %vm547_vm1  ;;  %v612_v48 = vand.u32 2147483648, %v1295_v5  ;;  %v610_v52 = vand.u32 2147483647, %v1295_v5 }
 0x245   : > { %638 = vperm.xlu2 %878, %v539_v31   ;;  %v543_v32 = vsub.f32 1.0, %v542_v24  ;;  %v572_v34 = vmul.f32 %v1300_v25, %v1292_v30  ;;  %vm577_vm6 = vweird.f32 %v1300_v25  ;;  %v567_v33 = vand.u32 2147483648, %v1297_v17 }
 0x246   : > { %v450_v1 = vpop.permute.xlu2 %449  ;;  %v565_v55 = vand.u32 2147483647, %v1297_v17  ;;  %vm606_vm9 = vweird.f32 %v1295_v5  ;;  %vm1320_vm10 = vmor %vm576_vm5, %vm577_vm6  ;;  %v613_v60 = vor.u32 1.1754944e-38, %v612_v48  ;;  %vm561_vm12 = vweird.f32 %v1297_v17 }
 0x247   : > { %v476_v28 = vadd.f32 %v450_v1, %v406_v59  ;;  %v544_v38 = vmul.f32 %v899_v10, %v543_v32  ;;  %v573_v39 = vsub.f32 1.0, %v572_v34  ;;  %vm611_vm13 = vcmp.eq.f32.partialorder %v610_v52, 8.507059e+37 }
 0x248   : > { %v568_v30 = vor.u32 1.1754944e-38, %v567_v33  ;;  %vm581_vm15 = vcmp.eq.f32.partialorder %v580_v53, 8.507059e+37  ;;  %vm566_vm0 = vcmp.eq.f32.partialorder %v565_v55, 8.507059e+37 }
 0x249   : > { %v903_v40 = vpop.eup %902  ;;  %v806_v26 = vmul.f32 -1.442695, %v476_v28  ;;  %v545_v37 = vadd.f32 %v899_v10, %v544_v38  ;;  %v574_v41 = vmul.f32 %v1300_v25, %v573_v39 }
 0x24a   : > { %v905_v42 = vpop.eup %904  ;;  %v602_v44 = vmul.f32 %v903_v40, %v1295_v5  ;;  %vm607_vm7 = vweird.f32 %v903_v40 }
 0x24b   : > { %906 = vpow2.f32 %v806_v26  ;;  %v549_v45 = vsel %vm548_vm3, %v899_v10, %v545_v37  ;;  %v557_v27 = vmul.f32 %v905_v42, %v1297_v17  ;;  %v575_v49 = vadd.f32 %v1300_v25, %v574_v41  ;;  %vm608_vm11 = vmor %vm606_vm9, %vm607_vm7 }
 0x24c   : > { %v554_v46 = vsel %vm551_vm4, %v553_v43, %v549_v45  ;;  %v603_v47 = vsub.f32 1.0, %v602_v44  ;;  %vm562_vm8 = vweird.f32 %v905_v42 }
 0x24d   : > { %643 = vperm.xlu1 %877, %v554_v46   ;;  %v558_v50 = vsub.f32 1.0, %v557_v27  ;;  %v579_v61 = vsel %vm1320_vm10, %v1300_v25, %v575_v49  ;;  %vm563_vm14 = vmor %vm561_vm12, %vm562_vm8 }
 0x24e   : > { %v604_v51 = vmul.f32 %v903_v40, %v603_v47  ;;  %v584_v10 = vsel %vm581_vm15, %v583_v58, %v579_v61 }
 0x24f   : > { %v559_v54 = vmul.f32 %v905_v42, %v558_v50 }
 0x250   : > { %v605_v56 = vadd.f32 %v903_v40, %v604_v51 }
 0x251   : > { %v907_v59 = vpop.eup %906  ;;  %v560_v62 = vadd.f32 %v905_v42, %v559_v54 }
 0x252   : > { %v508_v63 = vadd.f32 1.0, %v907_v59  ;;  %v609_v0 = vsel %vm608_vm11, %v903_v40, %v605_v56 }
 0x253   : > { %v614_v5 = vsel %vm611_vm13, %v613_v60, %v609_v0  ;;  %v564_v9 = vsel %vm563_vm14, %v905_v42, %v560_v62 }
 0x254   : > { %908 = vrcp.f32 %v508_v63  ;;  %663 = vperm.xlu0 %879, %v614_v5   ;;  %v569_v18 = vsel %vm566_vm0, %v568_v30, %v564_v9  ;;  %v597_v17 = vand.u32 2147483648, %v508_v63  ;;  %v595_v32 = vand.u32 2147483647, %v508_v63 }
 0x255   : > { %653 = vperm.xlu1 %877, %v584_v10   ;;  %648 = vperm.xlu2 %878, %v569_v18   ;;  %vm591_vm2 = vweird.f32 %v508_v63 }
 0x256   : > { %v598_v1 = vor.u32 1.1754944e-38, %v597_v17  ;;  %vm596_vm4 = vcmp.eq.f32.partialorder %v595_v32, 8.507059e+37 }
 0x25a   : > { %v909_v19 = vpop.eup %908 }
 0x25b   : > { %v587_v24 = vmul.f32 %v909_v19, %v508_v63  ;;  %vm592_vm1 = vweird.f32 %v909_v19 }
 0x25c   : > { %vm593_vm3 = vmor %vm591_vm2, %vm592_vm1 }
 0x25d   : > { %v588_v25 = vsub.f32 1.0, %v587_v24 }
 0x25f   : > { %v589_v31 = vmul.f32 %v909_v19, %v588_v25 }
 0x261   : > { %v590_v34 = vadd.f32 %v909_v19, %v589_v31 }
 0x263   : > { %v594_v35 = vsel %vm593_vm3, %v909_v19, %v590_v34 }
 0x264   : > { %v599_v36 = vsel %vm596_vm4, %v598_v1, %v594_v35 }
 0x265   : > { %658 = vperm.xlu2 %878, %v599_v36  }
 0x27f   : > { %v412_v28 = vpop.xlane.xlu2 %411 }
 0x287   : > { %v462_v38 = vpop.permute.xlu2 %461 }
 0x288   : > { %v478_v39 = vadd.f32 %v462_v38, %v412_v28 }
 0x28a   : > { %v808_v40 = vmul.f32 -1.442695, %v478_v39 }
 0x28c   : > { %910 = vpow2.f32 %v808_v40 }
 0x292   : > { %v911_v26 = vpop.eup %910 }
 0x293   : > { %v510_v37 = vadd.f32 1.0, %v911_v26 }
 0x295   : > { %912 = vrcp.f32 %v510_v37  ;;  %v625_v45 = vand.u32 2147483647, %v510_v37  ;;  %v627_v27 = vand.u32 2147483648, %v510_v37  ;;  %vm621_vm6 = vweird.f32 %v510_v37 }
 0x297   : > { %v628_v49 = vor.u32 1.1754944e-38, %v627_v27  ;;  %vm626_vm8 = vcmp.eq.f32.partialorder %v625_v45, 8.507059e+37 }
 0x29b   : > { %v913_v41 = vpop.eup %912 }
 0x29c   : > { %v617_v42 = vmul.f32 %v913_v41, %v510_v37  ;;  %vm622_vm5 = vweird.f32 %v913_v41 }
 0x29d   : > { %vm623_vm7 = vmor %vm621_vm6, %vm622_vm5 }
 0x29e   : > { %v618_v43 = vsub.f32 1.0, %v617_v42 }
 0x29f   : > { %v639_v44 = vpop.permute.xlu2 %638 }
 0x2a0   : > { %v673_v46 = vmul.f32 %v639_v44, %v1174_v11  ;;  %v674_v47 = vmul.f32 %v639_v44, %v1177_v12  ;;  %v619_v29 = vmul.f32 %v913_v41, %v618_v43 }
 0x2a2   : > { %689 = vst [vmem:[%s1333_s9 + $0x10] sm:$0xff] %v673_v46  ;;  %v620_v48 = vadd.f32 %v913_v41, %v619_v29 }
 0x2a3   : > { %690 = vst [vmem:[%s1333_s9 + $0x18] sm:$0xff] %v674_v47 }
 0x2a4   : > { %v624_v11 = vsel %vm623_vm7, %v913_v41, %v620_v48 }
 0x2a5   : > { %v629_v12 = vsel %vm626_vm8, %v628_v49, %v624_v11 }
 0x2a6   : > { %668 = vperm.xlu1 %877, %v629_v12  }
 0x2af   : > { %v634_v50 = vpop.permute.xlu1 %633  ;;  %v649_v51 = vpop.permute.xlu2 %648 }
 0x2b0   : > { %v671_v52 = vmul.f32 %v634_v50, %v1150_v2  ;;  %v672_v33 = vmul.f32 %v634_v50, %v1153_v3  ;;  %v677_v53 = vmul.f32 %v649_v51, %v1180_v13  ;;  %v678_v54 = vmul.f32 %v649_v51, %v1183_v14 }
 0x2b2   : > { %687 = vst [vmem:[%s1333_s9] sm:$0xff] %v671_v52 }
 0x2b3   : > { %688 = vst [vmem:[%s1333_s9 + $0x8] sm:$0xff] %v672_v33 }
 0x2b4   : > { %693 = vst [vmem:[%s1333_s9 + $0x30] sm:$0xff] %v677_v53 }
 0x2b5   : > { %694 = vst [vmem:[%s1333_s9 + $0x38] sm:$0xff] %v678_v54 }
 0x2bf   : > { %v644_v55 = vpop.permute.xlu1 %643  ;;  %v659_v56 = vpop.permute.xlu2 %658 }
 0x2c0   : > { %v675_v57 = vmul.f32 %v644_v55, %v1156_v4  ;;  %v676_v2 = vmul.f32 %v644_v55, %v1161_v6  ;;  %v681_v3 = vmul.f32 %v659_v56, %v1186_v15  ;;  %v682_v13 = vmul.f32 %v659_v56, %v1189_v16 }
 0x2c2   : > { %691 = vst [vmem:[%s1333_s9 + $0x20] sm:$0xff] %v675_v57 }
 0x2c3   : > { %692 = vst [vmem:[%s1333_s9 + $0x28] sm:$0xff] %v676_v2 }
 0x2c4   : > { %697 = vst [vmem:[%s1333_s9 + $0x50] sm:$0xff] %v681_v3 }
 0x2c5   : > { %698 = vst [vmem:[%s1333_s9 + $0x58] sm:$0xff] %v682_v13 }
 0x2c6   : > { %v664_v14 = vpop.permute.xlu0 %663 }
 0x2c7   : > { %v683_v58 = vmul.f32 %v664_v14, %v1198_v20  ;;  %v684_v59 = vmul.f32 %v664_v14, %v1201_v21  ;;  %v654_v4 = vpop.permute.xlu1 %653 }
 0x2c8   : > { %v679_v6 = vmul.f32 %v654_v4, %v1164_v7  ;;  %v680_v15 = vmul.f32 %v654_v4, %v1167_v8 }
 0x2c9   : > { %699 = vst [vmem:[%s1333_s9 + $0x60] sm:$0xff] %v683_v58 }
 0x2ca   : > { %700 = vst [vmem:[%s1333_s9 + $0x68] sm:$0xff] %v684_v59 }
 0x2cb   : > { %695 = vst [vmem:[%s1333_s9 + $0x40] sm:$0xff] %v679_v6 }
 0x2cc   : > { %696 = vst [vmem:[%s1333_s9 + $0x48] sm:$0xff] %v680_v15 }
 0x318   : > { %v669_v16 = vpop.permute.xlu1 %668 }
 0x319   : > { %v685_v20 = vmul.f32 %v669_v16, %v1204_v22  ;;  %v686_v7 = vmul.f32 %v669_v16, %v1207_v23 }
 0x31b   : > { %701 = vst [vmem:[%s1333_s9 + $0x70] sm:$0xff] %v685_v20 }
 0x31c   : > { %702 = vst [vmem:[%s1333_s9 + $0x78] sm:$0xff] %v686_v7 }
 0x31d   : > { %971 = shalt.err (!%p968_p4)
}
 0x31e   : > { %s1015_s12 = smov 256   ;;  %s1016_s28 = smov 16  }
 0x31f   : > { %818 = dma.vmem_to_hbm [thread:$0]  (%p1097_p11), %s717_s23, 2048, %s719_s25, %s704_s29, %s1015_s12, %s1015_s12, %s1016_s28  }
 0x320 PF: > { %s733_s9 = sand.u32 1, %s998_s18   ;;  %p1412_p7 = scmp.ge.s32.totalorder %s1010_s21, 2 }
 0x321   : > { %s734_s14 = scalar_lea.sflag [#allocation4], %s733_s9 }
 0x322   : > { %p825_p5 = pnand %p1412_p7, %p1101_p12 }
 0x324   : > { %p826_p8 = pneg %p825_p5 }
 0x326   : > { %993 = dma.done.wait (%p826_p8), %s734_s14, 2048  }
 0x327   : > { %995 = vsyncadd (%p826_p8), %s734_s14, 4294965248  ;;  %p18_p10 = scmp.ge.s32.totalorder %s1072_s24, 4   ;;  %s1413_s18 = smov %s1002_s19 }
 0x328   : > { %s1414_s19 = smov %s1006_s20  ;;  %s1415_s20 = smov %s1084_s27 }
 0x329   : > { %s1416_s21 = smov %s1072_s24  ;;  %20 = sbr.rel (!%p18_p10) target bundleno = 5 (0x5), region = 85 }
 0x32e   :  { %740 = vsyncpa [#allocation3], 1 }
 0x32f   :  { %742 = vsyncpa [#allocation3 + $0x1], 1 }
 0x330   :  { %743 = vsyncpa [#allocation4], 1 }
 0x331   :  { %745 = vsyncpa [#allocation4 + $0x1], 1 }

</bundles_post_ra>
